<compile_context>
chip_gen: v7x
topology: tpu7x:2x2x1
jax: 0.10.0
libtpu: 0.0.40
codegen_flags: <defaults>
</compile_context>

<pallas_src>
import functools

import jax
import jax.numpy as jnp
from jax import lax
from jax.experimental import pallas as pl
from jax.experimental.pallas import tpu as pltpu


# ---------------------------------------------------------------------------
# Helpers
# ---------------------------------------------------------------------------

def _round_up(v, m):
    return (v + m - 1) // m * m


def _silu(y, approx):
    """Numerically stable y * sigmoid(y) (no exp overflow for y << 0)."""
    z = jnp.exp(-jnp.abs(y))                      # EUP, z in (0, 1]
    num = jnp.where(y >= 0.0, 1.0, z)
    if approx:
        return y * num * pl.reciprocal(1.0 + z, approx=True)   # EUP reciprocal
    return y * num / (1.0 + z)


def fold_bn(gamma, beta, mean, var, eps=1e-5):
    """Fold inference-mode BatchNorm into a per-channel scale + bias."""
    scale = gamma / jnp.sqrt(var + eps)
    bias = beta - mean * scale
    return scale, bias


# ---------------------------------------------------------------------------
# Fused kernel: conv1(3x3)+BN+SiLU -> conv2(3x3)+BN+SiLU [+ residual]
# ---------------------------------------------------------------------------

def _bottleneck_kernel(xp_ref, w1_ref, b1_ref, w2_ref, b2_ref, m_ref,
                       o_ref, y1_ref, *, h, w, add, approx):
    # xp_ref: (1, C1p, Lp)   zero-padded input image, flattened (H+2)*(W+2)
    # wN_ref: (9, CoutP, CinP) per-tap weights with BN scale folded in
    # bN_ref: (CoutP, 1)     folded BN bias (f32)
    # m_ref : (1, H*(W+2))   1.0 on valid "wide" columns, 0.0 on garbage ones
    # o_ref : (1, C2p, H*(W+2))  "wide" output (wrapper slices valid columns)
    # y1_ref: VMEM scratch (C_p, Lp) — cv1 activation, re-padded for cv2
    wp = w + 2
    hww = h * wp
    cdt = w1_ref.dtype

    # ---- cv1: nine shifted lane-slices of the padded input, nine MXU dots ---
    acc = None
    for kh in range(3):
        for kw in range(3):
            off = kh * wp + kw
            xs = xp_ref[0, :, off:off + hww].astype(cdt)          # (C1p, hww)
            d = jnp.dot(w1_ref[kh * 3 + kw], xs,
                        preferred_element_type=jnp.float32)
            acc = d if acc is None else acc + d
    # Epilogue: folded-BN bias, SiLU, zero the wide-layout garbage columns
    # (they land exactly on cv2's zero-padding ring).
    y1 = _silu(acc + b1_ref[...], approx) * m_ref[...]

    # Restage cv1's activation as a zero-padded image in VMEM for cv2.
    y1_ref[...] = jnp.zeros_like(y1_ref)
    y1_ref[:, wp + 1:wp + 1 + hww] = y1.astype(y1_ref.dtype)

    # ---- cv2 (+ residual), same structure ----
    acc2 = None
    for kh in range(3):
        for kw in range(3):
            off = kh * wp + kw
            ys = y1_ref[:, off:off + hww]                         # (C_p, hww)
            d = jnp.dot(w2_ref[kh * 3 + kw], ys,
                        preferred_element_type=jnp.float32)
            acc2 = d if acc2 is None else acc2 + d
    y2 = _silu(acc2 + b2_ref[...], approx)
    if add:
        # Residual = the unpadded input, which is just a slice of xp (f32).
        y2 = y2 + xp_ref[0, :, wp + 1:wp + 1 + hww].astype(jnp.float32)
    o_ref[0] = y2.astype(o_ref.dtype)


# ---------------------------------------------------------------------------
# Wrapper
# ---------------------------------------------------------------------------

def v8_bottleneck(x, w1, bn1, w2, bn2, shortcut=True,
                  compute_dtype=jnp.bfloat16):
    """Forward of v8_Bottleneck (inference, BN folded). NCHW in / NCHW out."""
    n, c1, h, wd = x.shape
    c_ = w1.shape[0]
    c2 = w2.shape[0]
    assert w1.shape[1] == c1 and w2.shape[1] == c_, "g > 1 not supported"
    add = bool(shortcut and c1 == c2)

    s1, b1 = fold_bn(*bn1)
    s2, b2 = fold_bn(*bn2)

    # Pad channels to sublane multiples; pad flattened padded image to lanes.
    c1p = _round_up(c1, 8)
    c_p = _round_up(c_, 8)
    c2p = _round_up(c2, 8)
    hp, wp = h + 2, wd + 2
    hww = h * wp                       # "wide" output length per image
    lp = _round_up(hp * wp + 2, 128)   # +2: end of the (kh=2,kw=2) tap window

    # Input: zero-pad spatially (conv halo) and on channels, then flatten HxW.
    # Kept f32 so the residual add stays exact; matmul operands are cast
    # in-kernel to compute_dtype.
    xp = jnp.pad(x, ((0, 0), (0, c1p - c1), (1, 1), (1, 1)))
    xp = xp.reshape(n, c1p, hp * wp)
    xp = jnp.pad(xp, ((0, 0), (0, 0), (0, lp - hp * wp))).astype(jnp.float32)

    # Weights: fold BN scale in, reorder OIHW -> (tap, cout, cin), zero-pad.
    def prep_w(wgt, scale, cout, cout_p, cin, cin_p):
        wf = wgt * scale[:, None, None, None]
        wk = jnp.transpose(wf, (2, 3, 0, 1)).reshape(9, cout, cin)
        wk = jnp.pad(wk, ((0, 0), (0, cout_p - cout), (0, cin_p - cin)))
        return wk.astype(compute_dtype)

    w1k = prep_w(w1, s1, c_, c_p, c1, c1p)
    w2k = prep_w(w2, s2, c2, c2p, c_, c_p)
    b1p = jnp.pad(b1, (0, c_p - c_)).reshape(c_p, 1).astype(jnp.float32)
    b2p = jnp.pad(b2, (0, c2p - c2)).reshape(c2p, 1).astype(jnp.float32)

    # Valid-column mask for the "wide" layout.
    mask = (jnp.arange(hww) % wp < wd).astype(jnp.float32).reshape(1, hww)

    approx = jnp.dtype(compute_dtype) == jnp.dtype(jnp.bfloat16)
    kernel = functools.partial(_bottleneck_kernel, h=h, w=wd, add=add,
                               approx=approx)

    itemsize = jnp.dtype(compute_dtype).itemsize
    est = (2 * (c1p * lp * 4 + c2p * hww * 4)                 # in/out blocks
           + 2 * 9 * (c_p * c1p + c2p * c_p) * itemsize       # weights
           + 2 * (c_p + c2p + hww) * 4                        # biases + mask
           + c_p * lp * itemsize)                             # scratch
    vmem_limit = int(min(64 * 2 ** 20, max(16 * 2 ** 20, 6 * est)))

    out = pl.pallas_call(
        kernel,
        out_shape=jax.ShapeDtypeStruct((n, c2p, hww), x.dtype),
        grid_spec=pltpu.PrefetchScalarGridSpec(
            num_scalar_prefetch=0,
            grid=(n,),
            in_specs=[
                pl.BlockSpec((1, c1p, lp), lambda b: (b, 0, 0)),
                pl.BlockSpec((9, c_p, c1p), lambda b: (0, 0, 0)),
                pl.BlockSpec((c_p, 1), lambda b: (0, 0)),
                pl.BlockSpec((9, c2p, c_p), lambda b: (0, 0, 0)),
                pl.BlockSpec((c2p, 1), lambda b: (0, 0)),
                pl.BlockSpec((1, hww), lambda b: (0, 0)),
            ],
            out_specs=pl.BlockSpec((1, c2p, hww), lambda b: (b, 0, 0)),
            scratch_shapes=[pltpu.VMEM((c_p, lp), compute_dtype)],
        ),
        compiler_params=pltpu.CompilerParams(
            dimension_semantics=("parallel",),
            vmem_limit_bytes=vmem_limit),
    )(xp, w1k, b1p, w2k, b2p, mask)

    # Drop channel padding and the wide/garbage columns.
    return out.reshape(n, c2p, h, wp)[:, :c2, :, :wd]


# ---------------------------------------------------------------------------
# Pure-JAX reference
# ---------------------------------------------------------------------------

def _ref_conv_bn_silu(x, w, gamma, beta, mean, var, eps=1e-5):
    y = lax.conv_general_dilated(
        x, w, window_strides=(1, 1), padding=((1, 1), (1, 1)),
        dimension_numbers=("NCHW", "OIHW", "NCHW"),
        precision=lax.Precision.HIGHEST)
    scale = gamma / jnp.sqrt(var + eps)
    bias = beta - mean * scale
    y = y * scale[None, :, None, None] + bias[None, :, None, None]
    return y * jax.nn.sigmoid(y)


def _ref_bottleneck(x, w1, bn1, w2, bn2, shortcut=True):
    add = shortcut and (x.shape[1] == w2.shape[0])
    y = _ref_conv_bn_silu(x, w1, *bn1)
    y = _ref_conv_bn_silu(y, w2, *bn2)
    return x + y if add else y


if __name__ == "__main__":
    key = jax.random.PRNGKey(0)
    ks = jax.random.split(key, 11)

    # Shapes consistent with v8_Bottleneck(c1=4, c2=4, e=0.5): c_ = 2
    N, C1, H, W = 2, 4, 16, 16
    C2 = 4
    C_ = int(C2 * 0.5)

    x = jax.random.normal(ks[0], (N, C1, H, W), jnp.float32)

    w1 = jax.random.normal(ks[1], (C_, C1, 3, 3), jnp.float32) * 0.3
    bn1 = (1.0 + 0.1 * jax.random.normal(ks[2], (C_,), jnp.float32),   # gamma
           0.1 * jax.random.normal(ks[3], (C_,), jnp.float32),         # beta
           0.1 * jax.random.normal(ks[4], (C_,), jnp.float32),         # mean
           jax.random.uniform(ks[5], (C_,), jnp.float32, 0.5, 1.5))    # var

    w2 = jax.random.normal(ks[6], (C2, C_, 3, 3), jnp.float32) * 0.3
    bn2 = (1.0 + 0.1 * jax.random.normal(ks[7], (C2,), jnp.float32),
           0.1 * jax.random.normal(ks[8], (C2,), jnp.float32),
           0.1 * jax.random.normal(ks[9], (C2,), jnp.float32),
           jax.random.uniform(ks[10], (C2,), jnp.float32, 0.5, 1.5))

    y_ref = _ref_bottleneck(x, w1, bn1, w2, bn2, shortcut=True)

    # Exact (f32 MXU-operand) path: tight check of the kernel structure.
    y_f32 = jax.block_until_ready(
        v8_bottleneck(x, w1, bn1, w2, bn2, shortcut=True,
                      compute_dtype=jnp.float32))
    assert y_f32.shape == x.shape and y_f32.dtype == x.dtype
    err_f32 = float(jnp.max(jnp.abs(y_f32 - y_ref)))
    assert jnp.allclose(y_f32, y_ref, atol=2e-3, rtol=2e-3), err_f32

    # bf16 MXU-operand path (performance default; f32 accumulation/epilogue).
    y_bf16 = jax.block_until_ready(
        v8_bottleneck(x, w1, bn1, w2, bn2, shortcut=True,
                      compute_dtype=jnp.bfloat16))
    assert y_bf16.shape == x.shape and y_bf16.dtype == x.dtype
    err_bf16 = float(jnp.max(jnp.abs(y_bf16 - y_ref)))
    assert jnp.allclose(y_bf16, y_ref, atol=5e-2, rtol=5e-2), err_bf16

    print("KERNEL_OK")
</pallas_src>

<mosaic_0001>
module attributes {stable_mosaic.version = 11 : i64} {
  func.func @_bottleneck_kernel(%arg0: i32, %arg1: memref<1x8x384xf32, #tpu.memory_space<vmem>>, %arg2: memref<9x8x8xf32, #tpu.memory_space<vmem>>, %arg3: memref<8x1xf32, #tpu.memory_space<vmem>>, %arg4: memref<9x8x8xf32, #tpu.memory_space<vmem>>, %arg5: memref<8x1xf32, #tpu.memory_space<vmem>>, %arg6: memref<1x288xf32, #tpu.memory_space<vmem>>, %arg7: memref<1x8x288xf32, #tpu.memory_space<vmem>>, %arg8: memref<8x384xf32, #tpu.memory_space<vmem>>) attributes {dimension_semantics = [#tpu.dimension_semantics<parallel>], iteration_bounds = array<i64: 2>, scalar_prefetch = 0 : i64, scratch_operands = 1 : i64, tpu.core_type = #tpu.core_type<tc>, window_params = [{transform_indices = @transform_0, window_bounds = array<i64: 1, 8, 384>}, {pipeline_mode = #tpu.pipeline_mode<synchronous>, transform_indices = @transform_1, window_bounds = array<i64: 9, 8, 8>}, {pipeline_mode = #tpu.pipeline_mode<synchronous>, transform_indices = @transform_2, window_bounds = array<i64: 8, 1>}, {pipeline_mode = #tpu.pipeline_mode<synchronous>, transform_indices = @transform_3, window_bounds = array<i64: 9, 8, 8>}, {pipeline_mode = #tpu.pipeline_mode<synchronous>, transform_indices = @transform_4, window_bounds = array<i64: 8, 1>}, {pipeline_mode = #tpu.pipeline_mode<synchronous>, transform_indices = @transform_5, window_bounds = array<i64: 1, 288>}, {transform_indices = @transform_6, window_bounds = array<i64: 1, 8, 288>}]} {
    %c0 = arith.constant 0 : index
    %c0_0 = arith.constant 0 : index
    %c0_1 = arith.constant 0 : index
    %0 = vector.load %arg1[%c0, %c0_0, %c0_1] : memref<1x8x384xf32, #tpu.memory_space<vmem>>, vector<1x8x288xf32>
    %1 = vector.shape_cast %0 : vector<1x8x288xf32> to vector<8x288xf32>
    %c0_2 = arith.constant 0 : index
    %c0_3 = arith.constant 0 : index
    %c0_4 = arith.constant 0 : index
    %2 = vector.load %arg2[%c0_2, %c0_3, %c0_4] : memref<9x8x8xf32, #tpu.memory_space<vmem>>, vector<1x8x8xf32>
    %3 = vector.shape_cast %2 : vector<1x8x8xf32> to vector<8x8xf32>
    %cst = arith.constant dense<0.000000e+00> : vector<8x288xf32>
    %4 = tpu.matmul %3, %1, %cst {dimension_numbers = #tpu.dot_dimension_numbers<[1], [0], [0], [1], [0, 0, 1, 1], [], []>} : vector<8x8xf32>, vector<8x288xf32>, vector<8x288xf32> -> vector<8x288xf32>
    %c0_5 = arith.constant 0 : index
    %c0_6 = arith.constant 0 : index
    %c1 = arith.constant 1 : index
    %5 = vector.load %arg1[%c0_5, %c0_6, %c1] : memref<1x8x384xf32, #tpu.memory_space<vmem>>, vector<1x8x288xf32>
    %6 = vector.shape_cast %5 : vector<1x8x288xf32> to vector<8x288xf32>
    %c1_7 = arith.constant 1 : index
    %c0_8 = arith.constant 0 : index
    %c0_9 = arith.constant 0 : index
    %7 = vector.load %arg2[%c1_7, %c0_8, %c0_9] : memref<9x8x8xf32, #tpu.memory_space<vmem>>, vector<1x8x8xf32>
    %8 = vector.shape_cast %7 : vector<1x8x8xf32> to vector<8x8xf32>
    %cst_10 = arith.constant dense<0.000000e+00> : vector<8x288xf32>
    %9 = tpu.matmul %8, %6, %cst_10 {dimension_numbers = #tpu.dot_dimension_numbers<[1], [0], [0], [1], [0, 0, 1, 1], [], []>} : vector<8x8xf32>, vector<8x288xf32>, vector<8x288xf32> -> vector<8x288xf32>
    %10 = arith.addf %4, %9 : vector<8x288xf32>
    %c0_11 = arith.constant 0 : index
    %c0_12 = arith.constant 0 : index
    %c2 = arith.constant 2 : index
    %11 = vector.load %arg1[%c0_11, %c0_12, %c2] : memref<1x8x384xf32, #tpu.memory_space<vmem>>, vector<1x8x288xf32>
    %12 = vector.shape_cast %11 : vector<1x8x288xf32> to vector<8x288xf32>
    %c2_13 = arith.constant 2 : index
    %c0_14 = arith.constant 0 : index
    %c0_15 = arith.constant 0 : index
    %13 = vector.load %arg2[%c2_13, %c0_14, %c0_15] : memref<9x8x8xf32, #tpu.memory_space<vmem>>, vector<1x8x8xf32>
    %14 = vector.shape_cast %13 : vector<1x8x8xf32> to vector<8x8xf32>
    %cst_16 = arith.constant dense<0.000000e+00> : vector<8x288xf32>
    %15 = tpu.matmul %14, %12, %cst_16 {dimension_numbers = #tpu.dot_dimension_numbers<[1], [0], [0], [1], [0, 0, 1, 1], [], []>} : vector<8x8xf32>, vector<8x288xf32>, vector<8x288xf32> -> vector<8x288xf32>
    %16 = arith.addf %10, %15 : vector<8x288xf32>
    %c0_17 = arith.constant 0 : index
    %c0_18 = arith.constant 0 : index
    %c18 = arith.constant 18 : index
    %17 = vector.load %arg1[%c0_17, %c0_18, %c18] : memref<1x8x384xf32, #tpu.memory_space<vmem>>, vector<1x8x288xf32>
    %18 = vector.shape_cast %17 : vector<1x8x288xf32> to vector<8x288xf32>
    %c3 = arith.constant 3 : index
    %c0_19 = arith.constant 0 : index
    %c0_20 = arith.constant 0 : index
    %19 = vector.load %arg2[%c3, %c0_19, %c0_20] : memref<9x8x8xf32, #tpu.memory_space<vmem>>, vector<1x8x8xf32>
    %20 = vector.shape_cast %19 : vector<1x8x8xf32> to vector<8x8xf32>
    %cst_21 = arith.constant dense<0.000000e+00> : vector<8x288xf32>
    %21 = tpu.matmul %20, %18, %cst_21 {dimension_numbers = #tpu.dot_dimension_numbers<[1], [0], [0], [1], [0, 0, 1, 1], [], []>} : vector<8x8xf32>, vector<8x288xf32>, vector<8x288xf32> -> vector<8x288xf32>
    %22 = arith.addf %16, %21 : vector<8x288xf32>
    %c0_22 = arith.constant 0 : index
    %c0_23 = arith.constant 0 : index
    %c19 = arith.constant 19 : index
    %23 = vector.load %arg1[%c0_22, %c0_23, %c19] : memref<1x8x384xf32, #tpu.memory_space<vmem>>, vector<1x8x288xf32>
    %24 = vector.shape_cast %23 : vector<1x8x288xf32> to vector<8x288xf32>
    %c4 = arith.constant 4 : index
    %c0_24 = arith.constant 0 : index
    %c0_25 = arith.constant 0 : index
    %25 = vector.load %arg2[%c4, %c0_24, %c0_25] : memref<9x8x8xf32, #tpu.memory_space<vmem>>, vector<1x8x8xf32>
    %26 = vector.shape_cast %25 : vector<1x8x8xf32> to vector<8x8xf32>
    %cst_26 = arith.constant dense<0.000000e+00> : vector<8x288xf32>
    %27 = tpu.matmul %26, %24, %cst_26 {dimension_numbers = #tpu.dot_dimension_numbers<[1], [0], [0], [1], [0, 0, 1, 1], [], []>} : vector<8x8xf32>, vector<8x288xf32>, vector<8x288xf32> -> vector<8x288xf32>
    %28 = arith.addf %22, %27 : vector<8x288xf32>
    %c0_27 = arith.constant 0 : index
    %c0_28 = arith.constant 0 : index
    %c20 = arith.constant 20 : index
    %29 = vector.load %arg1[%c0_27, %c0_28, %c20] : memref<1x8x384xf32, #tpu.memory_space<vmem>>, vector<1x8x288xf32>
    %30 = vector.shape_cast %29 : vector<1x8x288xf32> to vector<8x288xf32>
    %c5 = arith.constant 5 : index
    %c0_29 = arith.constant 0 : index
    %c0_30 = arith.constant 0 : index
    %31 = vector.load %arg2[%c5, %c0_29, %c0_30] : memref<9x8x8xf32, #tpu.memory_space<vmem>>, vector<1x8x8xf32>
    %32 = vector.shape_cast %31 : vector<1x8x8xf32> to vector<8x8xf32>
    %cst_31 = arith.constant dense<0.000000e+00> : vector<8x288xf32>
    %33 = tpu.matmul %32, %30, %cst_31 {dimension_numbers = #tpu.dot_dimension_numbers<[1], [0], [0], [1], [0, 0, 1, 1], [], []>} : vector<8x8xf32>, vector<8x288xf32>, vector<8x288xf32> -> vector<8x288xf32>
    %34 = arith.addf %28, %33 : vector<8x288xf32>
    %c0_32 = arith.constant 0 : index
    %c0_33 = arith.constant 0 : index
    %c36 = arith.constant 36 : index
    %35 = vector.load %arg1[%c0_32, %c0_33, %c36] : memref<1x8x384xf32, #tpu.memory_space<vmem>>, vector<1x8x288xf32>
    %36 = vector.shape_cast %35 : vector<1x8x288xf32> to vector<8x288xf32>
    %c6 = arith.constant 6 : index
    %c0_34 = arith.constant 0 : index
    %c0_35 = arith.constant 0 : index
    %37 = vector.load %arg2[%c6, %c0_34, %c0_35] : memref<9x8x8xf32, #tpu.memory_space<vmem>>, vector<1x8x8xf32>
    %38 = vector.shape_cast %37 : vector<1x8x8xf32> to vector<8x8xf32>
    %cst_36 = arith.constant dense<0.000000e+00> : vector<8x288xf32>
    %39 = tpu.matmul %38, %36, %cst_36 {dimension_numbers = #tpu.dot_dimension_numbers<[1], [0], [0], [1], [0, 0, 1, 1], [], []>} : vector<8x8xf32>, vector<8x288xf32>, vector<8x288xf32> -> vector<8x288xf32>
    %40 = arith.addf %34, %39 : vector<8x288xf32>
    %c0_37 = arith.constant 0 : index
    %c0_38 = arith.constant 0 : index
    %c37 = arith.constant 37 : index
    %41 = vector.load %arg1[%c0_37, %c0_38, %c37] : memref<1x8x384xf32, #tpu.memory_space<vmem>>, vector<1x8x288xf32>
    %42 = vector.shape_cast %41 : vector<1x8x288xf32> to vector<8x288xf32>
    %c7 = arith.constant 7 : index
    %c0_39 = arith.constant 0 : index
    %c0_40 = arith.constant 0 : index
    %43 = vector.load %arg2[%c7, %c0_39, %c0_40] : memref<9x8x8xf32, #tpu.memory_space<vmem>>, vector<1x8x8xf32>
    %44 = vector.shape_cast %43 : vector<1x8x8xf32> to vector<8x8xf32>
    %cst_41 = arith.constant dense<0.000000e+00> : vector<8x288xf32>
    %45 = tpu.matmul %44, %42, %cst_41 {dimension_numbers = #tpu.dot_dimension_numbers<[1], [0], [0], [1], [0, 0, 1, 1], [], []>} : vector<8x8xf32>, vector<8x288xf32>, vector<8x288xf32> -> vector<8x288xf32>
    %46 = arith.addf %40, %45 : vector<8x288xf32>
    %c0_42 = arith.constant 0 : index
    %c0_43 = arith.constant 0 : index
    %c38 = arith.constant 38 : index
    %47 = vector.load %arg1[%c0_42, %c0_43, %c38] : memref<1x8x384xf32, #tpu.memory_space<vmem>>, vector<1x8x288xf32>
    %48 = vector.shape_cast %47 : vector<1x8x288xf32> to vector<8x288xf32>
    %c8 = arith.constant 8 : index
    %c0_44 = arith.constant 0 : index
    %c0_45 = arith.constant 0 : index
    %49 = vector.load %arg2[%c8, %c0_44, %c0_45] : memref<9x8x8xf32, #tpu.memory_space<vmem>>, vector<1x8x8xf32>
    %50 = vector.shape_cast %49 : vector<1x8x8xf32> to vector<8x8xf32>
    %cst_46 = arith.constant dense<0.000000e+00> : vector<8x288xf32>
    %51 = tpu.matmul %50, %48, %cst_46 {dimension_numbers = #tpu.dot_dimension_numbers<[1], [0], [0], [1], [0, 0, 1, 1], [], []>} : vector<8x8xf32>, vector<8x288xf32>, vector<8x288xf32> -> vector<8x288xf32>
    %52 = arith.addf %46, %51 : vector<8x288xf32>
    %c0_47 = arith.constant 0 : index
    %c0_48 = arith.constant 0 : index
    %53 = vector.load %arg3[%c0_47, %c0_48] : memref<8x1xf32, #tpu.memory_space<vmem>>, vector<8x1xf32>
    %54 = vector.broadcast %53 : vector<8x1xf32> to vector<8x288xf32>
    %55 = arith.addf %52, %54 : vector<8x288xf32>
    %56 = math.absf %55 : vector<8x288xf32>
    %cst_49 = arith.constant 0.000000e+00 : f32
    %57 = vector.broadcast %cst_49 : f32 to vector<8x288xf32>
    %58 = arith.subf %57, %56 : vector<8x288xf32>
    %59 = math.exp %58 : vector<8x288xf32>
    %cst_50 = arith.constant 0.000000e+00 : f32
    %60 = vector.broadcast %cst_50 : f32 to vector<8x288xf32>
    %61 = arith.cmpf oge, %55, %60 : vector<8x288xf32>
    %cst_51 = arith.constant 1.000000e+00 : f32
    %62 = vector.broadcast %cst_51 : f32 to vector<8x288xf32>
    %63 = arith.select %61, %62, %59 : vector<8x288xi1>, vector<8x288xf32>
    %64 = arith.mulf %55, %63 : vector<8x288xf32>
    %cst_52 = arith.constant 1.000000e+00 : f32
    %65 = vector.broadcast %cst_52 : f32 to vector<8x288xf32>
    %66 = arith.addf %65, %59 : vector<8x288xf32>
    %67 = arith.divf %64, %66 : vector<8x288xf32>
    %c0_53 = arith.constant 0 : index
    %c0_54 = arith.constant 0 : index
    %68 = vector.load %arg6[%c0_53, %c0_54] : memref<1x288xf32, #tpu.memory_space<vmem>>, vector<1x288xf32>
    %69 = vector.broadcast %68 : vector<1x288xf32> to vector<8x288xf32>
    %70 = arith.mulf %67, %69 : vector<8x288xf32>
    %cst_55 = arith.constant 0.000000e+00 : f32
    %71 = vector.broadcast %cst_55 : f32 to vector<8x384xf32>
    %c0_56 = arith.constant 0 : index
    %c0_57 = arith.constant 0 : index
    %72 = vector.load %arg8[%c0_56, %c0_57] : memref<8x384xf32, #tpu.memory_space<vmem>>, vector<8x384xf32>
    tpu.vector_store %arg8[%c0_56, %c0_57], %71 {strides = array<i32>} : memref<8x384xf32, #tpu.memory_space<vmem>>, vector<8x384xf32>,
    %c0_58 = arith.constant 0 : index
    %c19_59 = arith.constant 19 : index
    %73 = vector.load %arg8[%c0_58, %c19_59] : memref<8x384xf32, #tpu.memory_space<vmem>>, vector<8x288xf32>
    tpu.vector_store %arg8[%c0_58, %c19_59], %70 {strides = array<i32>} : memref<8x384xf32, #tpu.memory_space<vmem>>, vector<8x288xf32>,
    %c0_60 = arith.constant 0 : index
    %c0_61 = arith.constant 0 : index
    %74 = vector.load %arg8[%c0_60, %c0_61] : memref<8x384xf32, #tpu.memory_space<vmem>>, vector<8x288xf32>
    %c0_62 = arith.constant 0 : index
    %c0_63 = arith.constant 0 : index
    %c0_64 = arith.constant 0 : index
    %75 = vector.load %arg4[%c0_62, %c0_63, %c0_64] : memref<9x8x8xf32, #tpu.memory_space<vmem>>, vector<1x8x8xf32>
    %76 = vector.shape_cast %75 : vector<1x8x8xf32> to vector<8x8xf32>
    %cst_65 = arith.constant dense<0.000000e+00> : vector<8x288xf32>
    %77 = tpu.matmul %76, %74, %cst_65 {dimension_numbers = #tpu.dot_dimension_numbers<[1], [0], [0], [1], [0, 0, 1, 1], [], []>} : vector<8x8xf32>, vector<8x288xf32>, vector<8x288xf32> -> vector<8x288xf32>
    %c0_66 = arith.constant 0 : index
    %c1_67 = arith.constant 1 : index
    %78 = vector.load %arg8[%c0_66, %c1_67] : memref<8x384xf32, #tpu.memory_space<vmem>>, vector<8x288xf32>
    %c1_68 = arith.constant 1 : index
    %c0_69 = arith.constant 0 : index
    %c0_70 = arith.constant 0 : index
    %79 = vector.load %arg4[%c1_68, %c0_69, %c0_70] : memref<9x8x8xf32, #tpu.memory_space<vmem>>, vector<1x8x8xf32>
    %80 = vector.shape_cast %79 : vector<1x8x8xf32> to vector<8x8xf32>
    %cst_71 = arith.constant dense<0.000000e+00> : vector<8x288xf32>
    %81 = tpu.matmul %80, %78, %cst_71 {dimension_numbers = #tpu.dot_dimension_numbers<[1], [0], [0], [1], [0, 0, 1, 1], [], []>} : vector<8x8xf32>, vector<8x288xf32>, vector<8x288xf32> -> vector<8x288xf32>
    %82 = arith.addf %77, %81 : vector<8x288xf32>
    %c0_72 = arith.constant 0 : index
    %c2_73 = arith.constant 2 : index
    %83 = vector.load %arg8[%c0_72, %c2_73] : memref<8x384xf32, #tpu.memory_space<vmem>>, vector<8x288xf32>
    %c2_74 = arith.constant 2 : index
    %c0_75 = arith.constant 0 : index
    %c0_76 = arith.constant 0 : index
    %84 = vector.load %arg4[%c2_74, %c0_75, %c0_76] : memref<9x8x8xf32, #tpu.memory_space<vmem>>, vector<1x8x8xf32>
    %85 = vector.shape_cast %84 : vector<1x8x8xf32> to vector<8x8xf32>
    %cst_77 = arith.constant dense<0.000000e+00> : vector<8x288xf32>
    %86 = tpu.matmul %85, %83, %cst_77 {dimension_numbers = #tpu.dot_dimension_numbers<[1], [0], [0], [1], [0, 0, 1, 1], [], []>} : vector<8x8xf32>, vector<8x288xf32>, vector<8x288xf32> -> vector<8x288xf32>
    %87 = arith.addf %82, %86 : vector<8x288xf32>
    %c0_78 = arith.constant 0 : index
    %c18_79 = arith.constant 18 : index
    %88 = vector.load %arg8[%c0_78, %c18_79] : memref<8x384xf32, #tpu.memory_space<vmem>>, vector<8x288xf32>
    %c3_80 = arith.constant 3 : index
    %c0_81 = arith.constant 0 : index
    %c0_82 = arith.constant 0 : index
    %89 = vector.load %arg4[%c3_80, %c0_81, %c0_82] : memref<9x8x8xf32, #tpu.memory_space<vmem>>, vector<1x8x8xf32>
    %90 = vector.shape_cast %89 : vector<1x8x8xf32> to vector<8x8xf32>
    %cst_83 = arith.constant dense<0.000000e+00> : vector<8x288xf32>
    %91 = tpu.matmul %90, %88, %cst_83 {dimension_numbers = #tpu.dot_dimension_numbers<[1], [0], [0], [1], [0, 0, 1, 1], [], []>} : vector<8x8xf32>, vector<8x288xf32>, vector<8x288xf32> -> vector<8x288xf32>
    %92 = arith.addf %87, %91 : vector<8x288xf32>
    %c0_84 = arith.constant 0 : index
    %c19_85 = arith.constant 19 : index
    %93 = vector.load %arg8[%c0_84, %c19_85] : memref<8x384xf32, #tpu.memory_space<vmem>>, vector<8x288xf32>
    %c4_86 = arith.constant 4 : index
    %c0_87 = arith.constant 0 : index
    %c0_88 = arith.constant 0 : index
    %94 = vector.load %arg4[%c4_86, %c0_87, %c0_88] : memref<9x8x8xf32, #tpu.memory_space<vmem>>, vector<1x8x8xf32>
    %95 = vector.shape_cast %94 : vector<1x8x8xf32> to vector<8x8xf32>
    %cst_89 = arith.constant dense<0.000000e+00> : vector<8x288xf32>
    %96 = tpu.matmul %95, %93, %cst_89 {dimension_numbers = #tpu.dot_dimension_numbers<[1], [0], [0], [1], [0, 0, 1, 1], [], []>} : vector<8x8xf32>, vector<8x288xf32>, vector<8x288xf32> -> vector<8x288xf32>
    %97 = arith.addf %92, %96 : vector<8x288xf32>
    %c0_90 = arith.constant 0 : index
    %c20_91 = arith.constant 20 : index
    %98 = vector.load %arg8[%c0_90, %c20_91] : memref<8x384xf32, #tpu.memory_space<vmem>>, vector<8x288xf32>
    %c5_92 = arith.constant 5 : index
    %c0_93 = arith.constant 0 : index
    %c0_94 = arith.constant 0 : index
    %99 = vector.load %arg4[%c5_92, %c0_93, %c0_94] : memref<9x8x8xf32, #tpu.memory_space<vmem>>, vector<1x8x8xf32>
    %100 = vector.shape_cast %99 : vector<1x8x8xf32> to vector<8x8xf32>
    %cst_95 = arith.constant dense<0.000000e+00> : vector<8x288xf32>
    %101 = tpu.matmul %100, %98, %cst_95 {dimension_numbers = #tpu.dot_dimension_numbers<[1], [0], [0], [1], [0, 0, 1, 1], [], []>} : vector<8x8xf32>, vector<8x288xf32>, vector<8x288xf32> -> vector<8x288xf32>
    %102 = arith.addf %97, %101 : vector<8x288xf32>
    %c0_96 = arith.constant 0 : index
    %c36_97 = arith.constant 36 : index
    %103 = vector.load %arg8[%c0_96, %c36_97] : memref<8x384xf32, #tpu.memory_space<vmem>>, vector<8x288xf32>
    %c6_98 = arith.constant 6 : index
    %c0_99 = arith.constant 0 : index
    %c0_100 = arith.constant 0 : index
    %104 = vector.load %arg4[%c6_98, %c0_99, %c0_100] : memref<9x8x8xf32, #tpu.memory_space<vmem>>, vector<1x8x8xf32>
    %105 = vector.shape_cast %104 : vector<1x8x8xf32> to vector<8x8xf32>
    %cst_101 = arith.constant dense<0.000000e+00> : vector<8x288xf32>
    %106 = tpu.matmul %105, %103, %cst_101 {dimension_numbers = #tpu.dot_dimension_numbers<[1], [0], [0], [1], [0, 0, 1, 1], [], []>} : vector<8x8xf32>, vector<8x288xf32>, vector<8x288xf32> -> vector<8x288xf32>
    %107 = arith.addf %102, %106 : vector<8x288xf32>
    %c0_102 = arith.constant 0 : index
    %c37_103 = arith.constant 37 : index
    %108 = vector.load %arg8[%c0_102, %c37_103] : memref<8x384xf32, #tpu.memory_space<vmem>>, vector<8x288xf32>
    %c7_104 = arith.constant 7 : index
    %c0_105 = arith.constant 0 : index
    %c0_106 = arith.constant 0 : index
    %109 = vector.load %arg4[%c7_104, %c0_105, %c0_106] : memref<9x8x8xf32, #tpu.memory_space<vmem>>, vector<1x8x8xf32>
    %110 = vector.shape_cast %109 : vector<1x8x8xf32> to vector<8x8xf32>
    %cst_107 = arith.constant dense<0.000000e+00> : vector<8x288xf32>
    %111 = tpu.matmul %110, %108, %cst_107 {dimension_numbers = #tpu.dot_dimension_numbers<[1], [0], [0], [1], [0, 0, 1, 1], [], []>} : vector<8x8xf32>, vector<8x288xf32>, vector<8x288xf32> -> vector<8x288xf32>
    %112 = arith.addf %107, %111 : vector<8x288xf32>
    %c0_108 = arith.constant 0 : index
    %c38_109 = arith.constant 38 : index
    %113 = vector.load %arg8[%c0_108, %c38_109] : memref<8x384xf32, #tpu.memory_space<vmem>>, vector<8x288xf32>
    %c8_110 = arith.constant 8 : index
    %c0_111 = arith.constant 0 : index
    %c0_112 = arith.constant 0 : index
    %114 = vector.load %arg4[%c8_110, %c0_111, %c0_112] : memref<9x8x8xf32, #tpu.memory_space<vmem>>, vector<1x8x8xf32>
    %115 = vector.shape_cast %114 : vector<1x8x8xf32> to vector<8x8xf32>
    %cst_113 = arith.constant dense<0.000000e+00> : vector<8x288xf32>
    %116 = tpu.matmul %115, %113, %cst_113 {dimension_numbers = #tpu.dot_dimension_numbers<[1], [0], [0], [1], [0, 0, 1, 1], [], []>} : vector<8x8xf32>, vector<8x288xf32>, vector<8x288xf32> -> vector<8x288xf32>
    %117 = arith.addf %112, %116 : vector<8x288xf32>
    %c0_114 = arith.constant 0 : index
    %c0_115 = arith.constant 0 : index
    %118 = vector.load %arg5[%c0_114, %c0_115] : memref<8x1xf32, #tpu.memory_space<vmem>>, vector<8x1xf32>
    %119 = vector.broadcast %118 : vector<8x1xf32> to vector<8x288xf32>
    %120 = arith.addf %117, %119 : vector<8x288xf32>
    %121 = math.absf %120 : vector<8x288xf32>
    %cst_116 = arith.constant 0.000000e+00 : f32
    %122 = vector.broadcast %cst_116 : f32 to vector<8x288xf32>
    %123 = arith.subf %122, %121 : vector<8x288xf32>
    %124 = math.exp %123 : vector<8x288xf32>
    %cst_117 = arith.constant 0.000000e+00 : f32
    %125 = vector.broadcast %cst_117 : f32 to vector<8x288xf32>
    %126 = arith.cmpf oge, %120, %125 : vector<8x288xf32>
    %cst_118 = arith.constant 1.000000e+00 : f32
    %127 = vector.broadcast %cst_118 : f32 to vector<8x288xf32>
    %128 = arith.select %126, %127, %124 : vector<8x288xi1>, vector<8x288xf32>
    %129 = arith.mulf %120, %128 : vector<8x288xf32>
    %cst_119 = arith.constant 1.000000e+00 : f32
    %130 = vector.broadcast %cst_119 : f32 to vector<8x288xf32>
    %131 = arith.addf %130, %124 : vector<8x288xf32>
    %132 = arith.divf %129, %131 : vector<8x288xf32>
    %c0_120 = arith.constant 0 : index
    %c0_121 = arith.constant 0 : index
    %c19_122 = arith.constant 19 : index
    %133 = vector.load %arg1[%c0_120, %c0_121, %c19_122] : memref<1x8x384xf32, #tpu.memory_space<vmem>>, vector<1x8x288xf32>
    %134 = vector.shape_cast %133 : vector<1x8x288xf32> to vector<8x288xf32>
    %135 = arith.addf %132, %134 : vector<8x288xf32>
    %c0_123 = arith.constant 0 : index
    %c0_124 = arith.constant 0 : index
    %c0_125 = arith.constant 0 : index
    %136 = vector.load %arg7[%c0_123, %c0_124, %c0_125] : memref<1x8x288xf32, #tpu.memory_space<vmem>>, vector<1x8x288xf32>
    %137 = vector.shape_cast %136 : vector<1x8x288xf32> to vector<8x288xf32>
    %138 = vector.shape_cast %135 : vector<8x288xf32> to vector<1x8x288xf32>
    tpu.vector_store %arg7[%c0_123, %c0_124, %c0_125], %138 {strides = array<i32>} : memref<1x8x288xf32, #tpu.memory_space<vmem>>, vector<1x8x288xf32>,
    return
  }
  func.func @transform_0(%arg0: i32) -> (i32, i32, i32) {
    %c0_i32 = arith.constant 0 : i32
    %c0_i32_0 = arith.constant 0 : i32
    %c0_i32_1 = arith.constant 0 : i32
    return %arg0, %c0_i32, %c0_i32_0 : i32, i32, i32
  }
  func.func @transform_1(%arg0: i32) -> (i32, i32, i32) {
    %c0_i32 = arith.constant 0 : i32
    %c0_i32_0 = arith.constant 0 : i32
    %c0_i32_1 = arith.constant 0 : i32
    %c0_i32_2 = arith.constant 0 : i32
    return %c0_i32, %c0_i32_0, %c0_i32_1 : i32, i32, i32
  }
  func.func @transform_2(%arg0: i32) -> (i32, i32) {
    %c0_i32 = arith.constant 0 : i32
    %c0_i32_0 = arith.constant 0 : i32
    %c0_i32_1 = arith.constant 0 : i32
    return %c0_i32, %c0_i32_0 : i32, i32
  }
  func.func @transform_3(%arg0: i32) -> (i32, i32, i32) {
    %c0_i32 = arith.constant 0 : i32
    %c0_i32_0 = arith.constant 0 : i32
    %c0_i32_1 = arith.constant 0 : i32
    %c0_i32_2 = arith.constant 0 : i32
    return %c0_i32, %c0_i32_0, %c0_i32_1 : i32, i32, i32
  }
  func.func @transform_4(%arg0: i32) -> (i32, i32) {
    %c0_i32 = arith.constant 0 : i32
    %c0_i32_0 = arith.constant 0 : i32
    %c0_i32_1 = arith.constant 0 : i32
    return %c0_i32, %c0_i32_0 : i32, i32
  }
  func.func @transform_5(%arg0: i32) -> (i32, i32) {
    %c0_i32 = arith.constant 0 : i32
    %c0_i32_0 = arith.constant 0 : i32
    %c0_i32_1 = arith.constant 0 : i32
    return %c0_i32, %c0_i32_0 : i32, i32
  }
  func.func @transform_6(%arg0: i32) -> (i32, i32, i32) {
    %c0_i32 = arith.constant 0 : i32
    %c0_i32_0 = arith.constant 0 : i32
    %c0_i32_1 = arith.constant 0 : i32
    return %arg0, %c0_i32, %c0_i32_0 : i32, i32, i32
  }
}

</mosaic_0001>

<bundles_post_ra>
// kernel: tpu_custom_call.1
= control target key start
LH: loop header
LB: loop body
LE: loop exit
PB: predicated region body
PF: predicated region fallthrough
CT: control target
= control target key end

     0   :  { %11 = vsyncpa [#allocation4], 0  ;;  %s4142_s0 = inlined_call_operand.vmem [shape: f32[2,8,384], index: 0, kind: input, shape index: {}]   ;;  %s4143_s1 = inlined_call_operand.vmem [shape: f32[9,8,8], index: 1, kind: input, shape index: {}]   ;;  %s4144_s2 = inlined_call_operand.vmem [shape: f32[8,1], index: 2, kind: input, shape index: {}]   ;;  %s4145_s3 = inlined_call_operand.vmem [shape: f32[9,8,8], index: 3, kind: input, shape index: {}]   ;;  %s4146_s4 = inlined_call_operand.vmem [shape: f32[8,1], index: 4, kind: input, shape index: {}]   ;;  %s4147_s5 = inlined_call_operand.vmem [shape: f32[1,288], index: 5, kind: input, shape index: {}]   ;;  %s4148_s6 = inlined_call_operand.hbm [shape: f32[2,8,288], index: 6, kind: output, shape index: {}]  }
   0x1   :  { %13 = vsyncpa [#allocation4 + $0x1], 0  ;;  %s3744_s21 = smov 0   ;;  %s3746_s22 = smov 0  }
   0x2   :  { %s3748_s23 = smov 0   ;;  %s3750_s24 = smov 0  }
   0x3 LB: > { %s3765_s25 = sadd.s32 4294967295, %s3694_s24   ;;  %s3334_s26 = sadd.s32 4294967294, %s3694_s24   ;;  %s3694_s24 = sphi %s3750_s24, %s4154_s24   ;;  %s3690_s23 = sphi %s3748_s23, %s4153_s23   ;;  %s3686_s22 = sphi %s3746_s22, %s4152_s22   ;;  %s3682_s21 = sphi %s3744_s21, %s4151_s21  }
   0x4   : > { %s3769_s27 = sadd.s32 1, %s3694_s24   ;;  %s157_s28 = sadd.s32 1, %s3690_s23 }
   0x5   : > { %s154_s29 = ssub.s32 %s3694_s24, %s3769_s27  ;;  %p167_p0 = scmp.ne.s32.totalorder %s3690_s23, %s3686_s22 }
   0x6   : > { %p155_p1 = scmp.eq.s32.totalorder %s154_s29, 0  ;;  %p168_p2 = scmp.eq.s32.totalorder %s3765_s25, 1 }
   0x7   : > { %p173_p3 = scmp.ne.s32.totalorder %s3686_s22, %s3682_s21  ;;  %p174_p4 = scmp.eq.s32.totalorder %s3334_s26, 1 }
   0x8   : > { %s3780_s30 = scalar_select %p155_p1, %s3690_s23, %s157_s28  }
   0x9   : > { %p3782_p5 = por %p168_p2, %p167_p0  ;;  %p3786_p6 = por %p174_p4, %p173_p3 }
   0xa   : > { %p3337_p7 = scmp.ge.s32.totalorder %s3694_s24, 1  ;;  %p215_p8 = scmp.lt.s32.totalorder %s3694_s24, 3 }
   0xc   : > { %p216_p9 = pnand %p3337_p7, %p215_p8 }
   0xd   : > { %p245_p10 = scmp.lt.s32.totalorder (!%p216_p9), %s3765_s25, 1  ;;  %v3696_v0 = vmov (!%p216_p9), 0.0   ;;  %vm3697_vm0 = vmmov (!%p216_p9), 0   ;;  %s3698_s14 = smov (!%p216_p9), 127   ;;  %v1687_v4 = vld [vmem:[%s4144_s2] sm:$0xff] (!%p216_p9)  ;;  %v3706_v5 = vmov (!%p216_p9), 0  }
   0xe   : > { %219 = sbr.rel (%p216_p9) target bundleno = 1034 (0x40a), region = 44  ;;  %3430 = vmatprep.subr.mxu1 (!%p216_p9), %v3696_v0  ;;  %1746 = vst [vmem:[#allocation2] sm:$0xff] (!%p216_p9), %v3696_v0  ;;  %1748 = vst [vmem:[#allocation2 + $0x10] sm:$0xff] (!%p216_p9), %v3696_v0  ;;  %339 = vmatprep.mubr.f32.mxu0 (!%p216_p9), %v3696_v0  ;;  %s3699_s15 = smov (!%p216_p9), 126   ;;  %vm265_vm1 = vcmask (!%p216_p9), 1039360   ;;  %v3339_v11 = vld [vmem:[%s4143_s1 + $0x8] sm:$0xff] (!%p216_p9) }
   0xf   : > { %3432 = vmatprep.mubr.msk.f32.mxu1 (!%p216_p9), %vm3697_vm0, %v3696_v0  ;;  %s3700_s16 = smov (!%p216_p9), 110   ;;  %s3701_s17 = smov (!%p216_p9), 109   ;;  %3606 = vset.pattern.permute.xlu0 (!%p216_p9), %v3706_v5  ;;  %vm271_vm2 = vcmask (!%p216_p9), 64512   ;;  %vm568_vm3 = vcmask (!%p216_p9), 1031168   ;;  %v253_v16 = vld [vmem:[%s4143_s1] sm:$0xff] (!%p216_p9)  ;;  %vm729_vm4 = vcmask (!%p216_p9), 900096  }
  0x10   : > { %s3702_s18 = smov (!%p216_p9), 108   ;;  %s3703_s19 = smov (!%p216_p9), 92   ;;  %3607 = vset.pattern.permute.xlu1 (!%p216_p9), %v3706_v5  ;;  %v3344_v19 = vld [vmem:[%s4143_s1 + $0x10] sm:$0xff] (!%p216_p9)  ;;  %v3347_v24 = vld [vmem:[%s4143_s1 + $0x18] sm:$0xff] (!%p216_p9)  ;;  %vm890_vm5 = vcmask (!%p216_p9), 891904   ;;  %v3350_v27 = vld [vmem:[%s4143_s1 + $0x20] sm:$0xff] (!%p216_p9) }
  0x11   : > { %s3704_s20 = smov (!%p216_p9), 91   ;;  %s3705_s26 = smov (!%p216_p9), 90   ;;  %v3353_v32 = vld [vmem:[%s4143_s1 + $0x28] sm:$0xff] (!%p216_p9)  ;;  %vm1051_vm6 = vcmask (!%p216_p9), 883712   ;;  %v3356_v36 = vld [vmem:[%s4143_s1 + $0x30] sm:$0xff] (!%p216_p9)  ;;  %v3359_v40 = vld [vmem:[%s4143_s1 + $0x38] sm:$0xff] (!%p216_p9) }
  0x12   : > { %vm1212_vm7 = vcmask (!%p216_p9), 752640   ;;  %v3362_v46 = vld [vmem:[%s4143_s1 + $0x40] sm:$0xff] (!%p216_p9)  ;;  %vm1373_vm8 = vcmask (!%p216_p9), 744448   ;;  %vm1534_vm9 = vcmask (!%p216_p9), 736256   ;;  %s3707_s29 = smov (!%p216_p9), 19   ;;  %vm1764_vm13 = vcmask (!%p216_p9), 1047704  }
  0x13   : > { %vm1758_vm14 = vcmask (!%p216_p9), 154624   ;;  %vm1767_vm15 = vcmask (!%p216_p9), 416768  }
  0x15   : > { %s246_s9 = scalar_select %p245_p10, %s3765_s25, 1 }
  0x17   : > { %s3553_s10 = smul.u32 24, %s246_s9 }
  0x18   : > { %s3554_s9 = smul.u32 384, %s3765_s25 }
  0x19   : > { %s249_s13 = scalar_lea.vmem %s4142_s0, %s3553_s10 }
  0x1a   : > { %v3803_v1 = vld [vmem:[%s249_s13 + $0x8] sm:$0xff]  ;;  %v3805_v2 = vld [vmem:[%s249_s13] sm:$0xff]  ;;  %v3811_v3 = vld [vmem:[%s249_s13 + $0x10] sm:$0xff]  ;;  %s4098_s13 = scalar_lea.hbm %s4148_s6, %s3554_s9 }
  0x1b   : > { %261 = vrot.lane.b32.xlu0 %v3803_v1, %s3698_s14  ;;  %259 = vrot.lane.b32.xlu1 %v3805_v2, %s3698_s14 }
  0x1f   : > { %263 = vrot.lane.b32.xlu0 %v3811_v3, %s3698_s14  ;;  %564 = vrot.lane.b32.xlu1 %v3803_v1, %s3699_s15 }
  0x23   : > { %566 = vrot.lane.b32.xlu0 %v3811_v3, %s3699_s15  ;;  %562 = vrot.lane.b32.xlu1 %v3805_v2, %s3699_s15 }
  0x27   : > { %725 = vrot.lane.b32.xlu0 %v3803_v1, %s3700_s16  ;;  %727 = vrot.lane.b32.xlu1 %v3811_v3, %s3700_s16 }
  0x2b   : > { %723 = vrot.lane.b32.xlu0 %v3805_v2, %s3700_s16  ;;  %886 = vrot.lane.b32.xlu1 %v3803_v1, %s3701_s17 }
  0x2f   : > { %888 = vrot.lane.b32.xlu0 %v3811_v3, %s3701_s17  ;;  %884 = vrot.lane.b32.xlu1 %v3805_v2, %s3701_s17 }
  0x33   : > { %1047 = vrot.lane.b32.xlu0 %v3803_v1, %s3702_s18  ;;  %1049 = vrot.lane.b32.xlu1 %v3811_v3, %s3702_s18 }
  0x37   : > { %1045 = vrot.lane.b32.xlu0 %v3805_v2, %s3702_s18  ;;  %1208 = vrot.lane.b32.xlu1 %v3803_v1, %s3703_s19 }
  0x3b   : > { %1210 = vrot.lane.b32.xlu0 %v3811_v3, %s3703_s19  ;;  %1206 = vrot.lane.b32.xlu1 %v3805_v2, %s3703_s19 }
  0x3f   : > { %1369 = vrot.lane.b32.xlu0 %v3803_v1, %s3704_s20  ;;  %1371 = vrot.lane.b32.xlu1 %v3811_v3, %s3704_s20 }
  0x43   : > { %1367 = vrot.lane.b32.xlu0 %v3805_v2, %s3704_s20  ;;  %1530 = vrot.lane.b32.xlu1 %v3803_v1, %s3705_s26 }
  0x47   : > { %1532 = vrot.lane.b32.xlu0 %v3811_v3, %s3705_s26  ;;  %1528 = vrot.lane.b32.xlu1 %v3805_v2, %s3705_s26 }
  0x4b   : > { %1690 = vperm.xlu0 %3606, %v1687_v4  }
  0x8d   : > { %v262_v6 = vpop.permute.xlu0 %261  ;;  %v260_v7 = vpop.permute.xlu1 %259 }
  0x8e   : > { %v266_v12 = vsel %vm265_vm1, %v260_v7, %v262_v6 }
  0x91   : > { %v264_v8 = vpop.permute.xlu0 %263  ;;  %v565_v9 = vpop.permute.xlu1 %564 }
  0x92   : > { %3431 = vmatpush3.msra.mxu1 %v264_v8  ;;  %v267_v10 = vsel %vm265_vm1, %v262_v6, %v264_v8 }
  0x93   : > { %275 = vmatprep.subr.mxu0 %v267_v10  ;;  %3433 = vmatmul.mubr.msk.f32.vlgmr.msra.gmra.mrb[0].mxu1 %vm271_vm2, %v3339_v11 }
  0x94   : > { %276 = vmatpush1.msra.mxu0 %v266_v12  ;;  %3435 = vmatprep.subr.mxu1 %v3696_v0 }
  0x95   : > { %v567_v13 = vpop.permute.xlu0 %566  ;;  %3340 = vmatmul.mubr.msk.f32.vlgmr.msra.gmra.mrb[0].mxu0 %vm271_vm2, %v3339_v11  ;;  %419 = vmatprep.subr.mxu0 %v3803_v1  ;;  %v563_v14 = vpop.permute.xlu1 %562 }
  0x96   : > { %420 = vmatpush1.msra.mxu0 %v3805_v2  ;;  %483 = vmatprep.mubr.f32.mxu0 %v3696_v0  ;;  %v570_v15 = vsel %vm568_vm3, %v565_v9, %v567_v13  ;;  %v569_v20 = vsel %vm568_vm3, %v563_v14, %v565_v9 }
  0x97   : > { %3436 = vmatpush3.msra.mxu1 %v3811_v3  ;;  %577 = vmatprep.subr.mxu0 %v570_v15 }
  0x98   : > { %3437 = vmatprep.mubr.msk.f32.mxu1 %vm3697_vm0, %v3696_v0  ;;  %3440 = vmatprep.subr.mxu1 %v3696_v0 }
  0x99   : > { %v726_v17 = vpop.permute.xlu0 %725  ;;  %v728_v18 = vpop.permute.xlu1 %727  ;;  %3438 = vmatmul.mubr.msk.f32.vlgmr.msra.gmra.mrb[2].mxu1 %vm271_vm2, %v253_v16 }
  0x9a   : > { %3441 = vmatpush3.msra.mxu1 %v567_v13  ;;  %3442 = vmatprep.mubr.msk.f32.mxu1 %vm3697_vm0, %v3696_v0  ;;  %v731_v21 = vsel %vm729_vm4, %v726_v17, %v728_v18 }
  0x9b   : > { %3445 = vmatprep.subr.mxu1 %v3696_v0 }
  0x9d   : > { %v724_v22 = vpop.permute.xlu0 %723  ;;  %3342 = vmatmul.mubr.msk.f32.vlgmr.msra.gmra.mrb[0].mxu0 %vm271_vm2, %v253_v16  ;;  %v887_v23 = vpop.permute.xlu1 %886  ;;  %3443 = vmatmul.mubr.msk.f32.vlgmr.msra.gmra.mrb[4].mxu1 %vm271_vm2, %v3344_v19 }
  0x9e   : > { %578 = vmatpush1.msra.mxu0 %v569_v20  ;;  %641 = vmatprep.mubr.f32.mxu0 %v3696_v0  ;;  %v730_v28 = vsel %vm729_vm4, %v724_v22, %v726_v17 }
  0x9f   : > { %738 = vmatprep.subr.mxu0 %v731_v21  ;;  %3446 = vmatpush3.msra.mxu1 %v728_v18 }
  0xa0   : > { %3447 = vmatprep.mubr.msk.f32.mxu1 %vm3697_vm0, %v3696_v0  ;;  %3450 = vmatprep.subr.mxu1 %v3696_v0 }
  0xa1   : > { %v889_v25 = vpop.permute.xlu0 %888  ;;  %v885_v26 = vpop.permute.xlu1 %884  ;;  %3448 = vmatmul.mubr.msk.f32.vlgmr.msra.gmra.mrb[6].mxu1 %vm271_vm2, %v3347_v24 }
  0xa2   : > { %3451 = vmatpush3.msra.mxu1 %v889_v25  ;;  %3452 = vmatprep.mubr.msk.f32.mxu1 %vm3697_vm0, %v3696_v0  ;;  %v892_v29 = vsel %vm890_vm5, %v887_v23, %v889_v25  ;;  %v891_v35 = vsel %vm890_vm5, %v885_v26, %v887_v23 }
  0xa3   : > { %3455 = vmatprep.subr.mxu1 %v3696_v0 }
  0xa5   : > { %v1048_v30 = vpop.permute.xlu0 %1047  ;;  %3345 = vmatmul.mubr.msk.f32.vlgmr.msra.gmra.mrb[0].mxu0 %vm271_vm2, %v3344_v19  ;;  %v1050_v31 = vpop.permute.xlu1 %1049  ;;  %3453 = vmatmul.mubr.msk.f32.vlgmr.msra.gmra.mrb[8].mxu1 %vm271_vm2, %v3350_v27 }
  0xa6   : > { %739 = vmatpush1.msra.mxu0 %v730_v28  ;;  %802 = vmatprep.mubr.f32.mxu0 %v3696_v0  ;;  %v1053_v39 = vsel %vm1051_vm6, %v1048_v30, %v1050_v31 }
  0xa7   : > { %899 = vmatprep.subr.mxu0 %v892_v29  ;;  %3456 = vmatpush3.msra.mxu1 %v1050_v31 }
  0xa8   : > { %3457 = vmatprep.mubr.msk.f32.mxu1 %vm3697_vm0, %v3696_v0  ;;  %3460 = vmatprep.subr.mxu1 %v3696_v0 }
  0xa9   : > { %v1046_v33 = vpop.permute.xlu0 %1045  ;;  %v1209_v34 = vpop.permute.xlu1 %1208  ;;  %3458 = vmatmul.mubr.msk.f32.vlgmr.msra.gmra.mrb[10].mxu1 %vm271_vm2, %v3353_v32 }
  0xaa   : > { %3462 = vmatprep.mubr.msk.f32.mxu1 %vm3697_vm0, %v3696_v0  ;;  %v1052_v43 = vsel %vm1051_vm6, %v1046_v33, %v1048_v30 }
  0xad   : > { %v1211_v37 = vpop.permute.xlu0 %1210  ;;  %3348 = vmatmul.mubr.msk.f32.vlgmr.msra.gmra.mrb[0].mxu0 %vm271_vm2, %v3347_v24  ;;  %v1207_v38 = vpop.permute.xlu1 %1206 }
  0xae   : > { %900 = vmatpush1.msra.mxu0 %v891_v35  ;;  %3461 = vmatpush3.msra.mxu1 %v1211_v37  ;;  %v1214_v44 = vsel %vm1212_vm7, %v1209_v34, %v1211_v37  ;;  %v1213_v48 = vsel %vm1212_vm7, %v1207_v38, %v1209_v34  ;;  %v1726_v38 = vld [vmem:[%s4147_s5] sm:$0x7] }
  0xaf   : > { %3463 = vmatmul.mubr.msk.f32.vlgmr.msra.gmra.mrb[12].mxu1 %vm271_vm2, %v3356_v36  ;;  %963 = vmatprep.mubr.f32.mxu0 %v3696_v0 }
  0xb0   : > { %1060 = vmatprep.subr.mxu0 %v1053_v39  ;;  %3465 = vmatprep.subr.mxu1 %v3696_v0 }
  0xb1   : > { %v1370_v41 = vpop.permute.xlu0 %1369  ;;  %v1372_v42 = vpop.permute.xlu1 %1371  ;;  %3467 = vmatprep.mubr.msk.f32.mxu1 %vm3697_vm0, %v3696_v0 }
  0xb2   : > { %3466 = vmatpush3.msra.mxu1 %v1372_v42  ;;  %v1375_v49 = vsel %vm1373_vm8, %v1370_v41, %v1372_v42 }
  0xb3   : > { %3468 = vmatmul.mubr.msk.f32.vlgmr.msra.gmra.mrb[14].mxu1 %vm271_vm2, %v3359_v40  ;;  %3470 = vmatprep.subr.mxu1 %v3696_v0 }
  0xb4   : > { %3472 = vmatprep.mubr.msk.f32.mxu1 %vm3697_vm0, %v3696_v0 }
  0xb5   : > { %v1368_v45 = vpop.permute.xlu0 %1367  ;;  %3351 = vmatmul.mubr.msk.f32.vlgmr.msra.gmra.mrb[0].mxu0 %vm271_vm2, %v3350_v27  ;;  %v1531_v50 = vpop.permute.xlu1 %1530  ;;  %v1728_v27 = vlaneseq }
  0xb6   : > { %1061 = vmatpush1.msra.mxu0 %v1052_v43  ;;  %1124 = vmatprep.mubr.f32.mxu0 %v3696_v0  ;;  %v1374_v51 = vsel %vm1373_vm8, %v1368_v45, %v1370_v41 }
  0xb7   : > { %1221 = vmatprep.subr.mxu0 %v1214_v44  ;;  %v1729_v29 = vshrl.u32 %v1728_v27, 7 }
  0xb9   : > { %v1533_v47 = vpop.permute.xlu0 %1532  ;;  %v1529_v53 = vpop.permute.xlu1 %1528  ;;  %v1738_v35 = vsub.s32 2, %v1729_v29 }
  0xba   : > { %3471 = vmatpush3.msra.mxu1 %v1533_v47  ;;  %v1536_v52 = vsel %vm1534_vm9, %v1531_v50, %v1533_v47  ;;  %v1535_v54 = vsel %vm1534_vm9, %v1529_v53, %v1531_v50 }
  0xbb   : > { %3473 = vmatmul.mubr.msk.f32.vlgmr.msra.gmra.mrb[16].mxu1 %vm271_vm2, %v3362_v46  ;;  %3475 = vmatprep.subr.mxu1 %v3696_v0  ;;  %v1739_v43 = vrot.slane %v1726_v38, %v1738_v35 }
  0xbc   : > { %3477 = vmatprep.mubr.msk.f32.mxu1 %vm3697_vm0, %v3696_v0 }
  0xbd   : > { %3354 = vmatmul.mubr.msk.f32.vlgmr.msra.gmra.mrb[0].mxu0 %vm271_vm2, %v3353_v32 }
  0xbe   : > { %1222 = vmatpush1.msra.mxu0 %v1213_v48  ;;  %1285 = vmatprep.mubr.f32.mxu0 %v3696_v0 }
  0xbf   : > { %1382 = vmatprep.subr.mxu0 %v1375_v49 }
  0xc5   : > { %3357 = vmatmul.mubr.msk.f32.vlgmr.msra.gmra.mrb[0].mxu0 %vm271_vm2, %v3356_v36 }
  0xc6   : > { %1383 = vmatpush1.msra.mxu0 %v1374_v51  ;;  %1446 = vmatprep.mubr.f32.mxu0 %v3696_v0 }
  0xc7   : > { %1543 = vmatprep.subr.mxu0 %v1536_v52  ;;  %v1730_v52 = vsub.s32 0, %v1729_v29 }
  0xca   : > { %v1691_v19 = vpop.permute.xlu0 %1690 }
  0xcd   : > { %3360 = vmatmul.mubr.msk.f32.vlgmr.msra.gmra.mrb[0].mxu0 %vm271_vm2, %v3359_v40 }
  0xce   : > { %1544 = vmatpush1.msra.mxu0 %v1535_v54  ;;  %1607 = vmatprep.mubr.f32.mxu0 %v3696_v0 }
  0xd5   : > { %3363 = vmatmul.mubr.msk.f32.vlgmr.msra.gmra.mrb[0].mxu0 %vm271_vm2, %v3362_v46 }
  0xd6   : > { %1856 = vmatprep.mubr.f32.mxu0 %v3696_v0 }
 0x166   : > { %v412_v55 = vpop.f32.mrb[0].mxu1 }
 0x167   : > { %v3434_v56 = vpop.f32.mrb[1].mxu1 }
 0x168   : > { %v1731_v56 = vrot.slane %v1726_v38, %v1730_v52  ;;  %v3388_v52 = vld [vmem:[%s4145_s3 + $0x40] sm:$0xff] }
 0x16c   : > { %v556_v57 = vpop.f32.mrb[2].mxu1 }
 0x16d   : > { %v557_v58 = vadd.f32 %v556_v57, %v412_v55  ;;  %v3439_v59 = vpop.f32.mrb[3].mxu1  ;;  %v1734_v57 = vsub.s32 1, %v1729_v29 }
 0x170   : > { %v714_v60 = vpop.f32.mrb[4].mxu1 }
 0x171   : > { %v720_v61 = vadd.f32 %v714_v60, %v557_v58  ;;  %v3444_v62 = vpop.f32.mrb[5].mxu1 }
 0x174   : > { %v875_v63 = vpop.f32.mrb[6].mxu1 }
 0x175   : > { %v881_v4 = vadd.f32 %v875_v63, %v720_v61  ;;  %v3449_v5 = vpop.f32.mrb[7].mxu1 }
 0x178   : > { %v1036_v6 = vpop.f32.mrb[8].mxu1 }
 0x179   : > { %v1042_v7 = vadd.f32 %v1036_v6, %v881_v4  ;;  %v3454_v8 = vpop.f32.mrb[9].mxu1  ;;  %v1735_v4 = vrot.slane %v1726_v38, %v1734_v57 }
 0x17c   : > { %v1197_v9 = vpop.f32.mrb[10].mxu1 }
 0x17d   : > { %v1203_v10 = vadd.f32 %v1197_v9, %v1042_v7  ;;  %v3459_v11 = vpop.f32.mrb[11].mxu1 }
 0x182   : > { %v1358_v12 = vpop.f32.mrb[12].mxu1 }
 0x183   : > { %v1364_v13 = vadd.f32 %v1358_v12, %v1203_v10  ;;  %v3464_v14 = vpop.f32.mrb[13].mxu1 }
 0x186   : > { %v1519_v15 = vpop.f32.mrb[14].mxu1 }
 0x187   : > { %v1525_v16 = vadd.f32 %v1519_v15, %v1364_v13  ;;  %v3469_v17 = vpop.f32.mrb[15].mxu1  ;;  %v3197_v13 = vld [vmem:[%s4146_s4] sm:$0xff] }
 0x188   : > { %v3365_v17 = vld [vmem:[%s4145_s3 + $0x8] sm:$0xff] }
 0x18e   : > { %v1680_v18 = vpop.f32.mrb[16].mxu1 }
 0x18f   : > { %v1686_v20 = vadd.f32 %v1680_v18, %v1525_v16  ;;  %v3474_v21 = vpop.f32.mrb[17].mxu1 }
 0x191   : > { %v1695_v22 = vadd.f32 %v1691_v19, %v1686_v20 }
 0x193   : > { %v1698_v23 = vand.u32 2147483647, %v1695_v22  ;;  %vm1710_vm10 = vcmp.ge.f32.partialorder %v1695_v22, 0.0 }
 0x195   : > { %v1701_v24 = vsub.f32 0.0, %v1698_v23  ;;  %v3370_v23 = vld [vmem:[%s4145_s3 + $0x10] sm:$0xff] }
 0x197   : > { %v1706_v25 = vmul.f32 1.442695, %v1701_v24 }
 0x199   : > { %3608 = vpow2.f32 %v1706_v25 }
 0x1a3   : > { %v3609_v26 = vpop.eup %3608 }
 0x1a4   : > { %v1719_v28 = vadd.f32 1.0, %v3609_v26  ;;  %v1713_v37 = vsel %vm1710_vm10, 1.0, %v3609_v26 }
 0x1a5   : > { %v1716_v42 = vmul.f32 %v1713_v37, %v1695_v22  ;;  %v3379_v37 = vld [vmem:[%s4145_s3 + $0x28] sm:$0xff] }
 0x1a6   : > { %3610 = vrcp.f32 %v1719_v28  ;;  %v3373_v28 = vld [vmem:[%s4145_s3 + $0x18] sm:$0xff] }
 0x1a8   : > { %v1609_v30 = vpop.f32.mrb[0].mxu0 }
 0x1a9   : > { %v1693_v31 = vadd.f32 %v1691_v19, %v1609_v30  ;;  %v1611_v32 = vpop.f32.mrb[1].mxu0 }
 0x1aa   : > { %v1694_v33 = vadd.f32 %v1691_v19, %v1611_v32  ;;  %v1772_v19 = vld [vmem:[%s4145_s3] sm:$0xff] }
 0x1ab   : > { %v1696_v34 = vand.u32 2147483647, %v1693_v31  ;;  %vm1708_vm11 = vcmp.ge.f32.partialorder %v1693_v31, 0.0  ;;  %v3376_v32 = vld [vmem:[%s4145_s3 + $0x20] sm:$0xff] }
 0x1ac   : > { %v1697_v36 = vand.u32 2147483647, %v1694_v33  ;;  %vm1709_vm12 = vcmp.ge.f32.partialorder %v1694_v33, 0.0 }
 0x1ad   : > { %v1699_v39 = vsub.f32 0.0, %v1696_v34 }
 0x1ae   : > { %v1700_v40 = vsub.f32 0.0, %v1697_v36 }
 0x1af   : > { %v1702_v41 = vmul.f32 1.442695, %v1699_v39 }
 0x1b0   : > { %v3611_v44 = vpop.eup %3610  ;;  %v1704_v45 = vmul.f32 1.442695, %v1700_v40  ;;  %v3382_v40 = vld [vmem:[%s4145_s3 + $0x30] sm:$0xff] }
 0x1b1   : > { %3612 = vpow2.f32 %v1702_v41  ;;  %v1725_v46 = vmul.f32 %v3611_v44, %v1716_v42 }
 0x1b2   : > { %3614 = vpow2.f32 %v1704_v45 }
 0x1b3   : > { %v1745_v47 = vmul.f32 %v1739_v43, %v1725_v46 }
 0x1b5   : > { %1756 = vrot.lane.b32.xlu0 %v1745_v47, %s3707_s29  ;;  %v3385_v47 = vld [vmem:[%s4145_s3 + $0x38] sm:$0xff] }
 0x1bb   : > { %v3613_v48 = vpop.eup %3612 }
 0x1bc   : > { %v3615_v49 = vpop.eup %3614  ;;  %v1717_v50 = vadd.f32 1.0, %v3613_v48  ;;  %v1711_v53 = vsel %vm1708_vm11, 1.0, %v3613_v48 }
 0x1bd   : > { %v1718_v51 = vadd.f32 1.0, %v3615_v49  ;;  %v1712_v54 = vsel %vm1709_vm12, 1.0, %v3615_v49  ;;  %v1714_v55 = vmul.f32 %v1711_v53, %v1693_v31 }
 0x1be   : > { %3616 = vrcp.f32 %v1717_v50  ;;  %v1715_v60 = vmul.f32 %v1712_v54, %v1694_v33 }
 0x1bf   : > { %3618 = vrcp.f32 %v1718_v51 }
 0x1c8   : > { %v3617_v58 = vpop.eup %3616 }
 0x1c9   : > { %v3619_v59 = vpop.eup %3618  ;;  %v1721_v61 = vmul.f32 %v3617_v58, %v1714_v55 }
 0x1ca   : > { %v1723_v63 = vmul.f32 %v3619_v59, %v1715_v60 }
 0x1cb   : > { %v1743_v62 = vmul.f32 %v1731_v56, %v1721_v61 }
 0x1cc   : > { %v1744_v5 = vmul.f32 %v1735_v4, %v1723_v63 }
 0x1cd   : > { %1752 = vrot.lane.b32.xlu1 %v1743_v62, %s3707_s29 }
 0x1d1   : > { %1754 = vrot.lane.b32.xlu1 %v1744_v5, %s3707_s29  ;;  %s3708_s29 = smov [#allocation3]  }
 0x227   : > { %v1757_v7 = vpop.permute.xlu0 %1756 }
 0x23f   : > { %v1753_v6 = vpop.permute.xlu1 %1752 }
 0x240   : > { %1765 = vst.msk [vmem:[#allocation2] sm:$0xff] %vm1764_vm13, %v1753_v6 }
 0x243   : > { %v1755_v8 = vpop.permute.xlu1 %1754 }
 0x244   : > { %v1759_v9 = vsel %vm1758_vm14, %v1753_v6, %v1755_v8  ;;  %v1760_v10 = vsel %vm1758_vm14, %v1755_v8, %v1757_v7 }
 0x245   : > { %1768 = vst.msk [vmem:[#allocation2 + $0x10] sm:$0xff] %vm1767_vm15, %v1760_v10  ;;  %1780 = vrot.lane.b32.xlu1 %v1759_v9, %s3698_s14 }
 0x247   : > { %v1769_v11 = vld [vmem:[#allocation2] sm:$0xff] }
 0x249   : > { %1778 = vrot.lane.b32.xlu1 %v1769_v11, %s3698_s14 }
 0x24c   : > { %v1771_v12 = vld [vmem:[#allocation2 + $0x10] sm:$0xff] }
 0x24d   : > { %1782 = vrot.lane.b32.xlu0 %v1771_v12, %s3698_s14  ;;  %2083 = vrot.lane.b32.xlu1 %v1771_v12, %s3699_s15  ;;  %s3636_s14 = sshll.u32 %s3708_s29, 4  ;;  %s3637_s14 = int_to_ptr.vmem [resolvable:$false] %s3636_s14 }
 0x251   : > { %2081 = vrot.lane.b32.xlu0 %v1759_v9, %s3699_s15  ;;  %2241 = vrot.lane.b32.xlu1 %v1759_v9, %s3700_s16 }
 0x255   : > { %2079 = vrot.lane.b32.xlu0 %v1769_v11, %s3699_s15  ;;  %2239 = vrot.lane.b32.xlu1 %v1769_v11, %s3700_s16  ;;  %s3638_s15 = scalar_lea.vmem %s3637_s14, 768 }
 0x259   : > { %2243 = vrot.lane.b32.xlu0 %v1771_v12, %s3700_s16  ;;  %2403 = vrot.lane.b32.xlu1 %v1771_v12, %s3701_s17 }
 0x25d   : > { %2401 = vrot.lane.b32.xlu0 %v1759_v9, %s3701_s17  ;;  %2561 = vrot.lane.b32.xlu1 %v1759_v9, %s3702_s18 }
 0x261   : > { %2399 = vrot.lane.b32.xlu0 %v1769_v11, %s3701_s17  ;;  %2559 = vrot.lane.b32.xlu1 %v1769_v11, %s3702_s18 }
 0x265   : > { %2563 = vrot.lane.b32.xlu0 %v1771_v12, %s3702_s18  ;;  %2723 = vrot.lane.b32.xlu1 %v1771_v12, %s3703_s19 }
 0x269   : > { %2721 = vrot.lane.b32.xlu0 %v1759_v9, %s3703_s19  ;;  %2881 = vrot.lane.b32.xlu1 %v1759_v9, %s3704_s20 }
 0x26d   : > { %2719 = vrot.lane.b32.xlu0 %v1769_v11, %s3703_s19  ;;  %2879 = vrot.lane.b32.xlu1 %v1769_v11, %s3704_s20  ;;  %s242_s19 = sand.u32 1, %s3686_s22  }
 0x26e   : > { %s3261_s25 = scalar_lea.sflag [#allocation4], %s242_s19 }
 0x271   : > { %2883 = vrot.lane.b32.xlu0 %v1771_v12, %s3704_s20  ;;  %3043 = vrot.lane.b32.xlu1 %v1771_v12, %s3705_s26  ;;  %s3552_s20 = smul.u32 24, %s242_s19 }
 0x275   : > { %3041 = vrot.lane.b32.xlu0 %v1759_v9, %s3705_s26  ;;  %3200 = vperm.xlu1 %3607, %v3197_v13  }
 0x279   : > { %3039 = vrot.lane.b32.xlu0 %v1769_v11, %s3705_s26  ;;  %3244 = vrot.lane.b32.xlu1 %v3803_v1, %s3701_s17  ;;  %s244_s26 = scalar_lea.vmem [#allocation3], %s3552_s20 }
 0x27a   : > { %s3275_s10 = sshll.u32 %s244_s26, 4  ;;  %s4100_s10 = int_to_ptr.vmem [resolvable:$true] %s3275_s10 }
 0x27b   : > { %s3632_s28 = scalar_lea.vmem %s4100_s10, 384  ;;  %p3639_p0 = scmp.lt.s32.totalorder %s4100_s10, %s3637_s14 }
 0x27c   : > { %p3633_p11 = scmp.ne.s32.totalorder %s4100_s10, %s3632_s28  ;;  %p3640_p1 = scmp.lt.s32.totalorder %s3638_s15, %s3632_s28 }
 0x27d   : > { %3242 = vrot.lane.b32.xlu0 %v3805_v2, %s3701_s17 }
 0x27e   : > { %p3634_p12 = pnand %p3633_p11, %p3782_p5  ;;  %p3641_p2 = por %p3640_p1, %p3639_p0 }
 0x280   : > { %p3635_p13 = pneg %p3634_p12 }
 0x281   : > { %3246 = vrot.lane.b32.xlu0 %v3811_v3, %s3701_s17 }
 0x282   : > { %p3642_p3 = pnand %p3641_p2, %p3635_p13 }
 0x2b7   : > { %v1781_v14 = vpop.permute.xlu1 %1780 }
 0x2bb   : > { %v1779_v15 = vpop.permute.xlu1 %1778 }
 0x2bc   : > { %v1784_v3 = vsel %vm265_vm1, %v1779_v15, %v1781_v14 }
 0x2bf   : > { %v1783_v16 = vpop.permute.xlu0 %1782  ;;  %v2084_v18 = vpop.permute.xlu1 %2083 }
 0x2c0   : > { %3476 = vmatpush3.msra.mxu1 %v1783_v16  ;;  %v1785_v2 = vsel %vm265_vm1, %v1781_v14, %v1783_v16  ;;  %vm3258_vm1 = vcmask 261120  }
 0x2c1   : > { %1792 = vmatprep.subr.mxu0 %v1785_v2  ;;  %3480 = vmatprep.subr.mxu1 %v3696_v0 }
 0x2c2   : > { %3478 = vmatmul.mubr.msk.f32.vlgmr.msra.gmra.mrb[18].mxu1 %vm271_vm2, %v3365_v17  ;;  %1793 = vmatpush1.msra.mxu0 %v1784_v3 }
 0x2c3   : > { %3481 = vmatpush3.msra.mxu1 %v1771_v12  ;;  %v2082_v1 = vpop.permute.xlu0 %2081  ;;  %3366 = vmatmul.mubr.msk.f32.vlgmr.msra.gmra.mrb[2].mxu0 %vm271_vm2, %v3365_v17  ;;  %v2242_v20 = vpop.permute.xlu1 %2241 }
 0x2c4   : > { %1936 = vmatprep.subr.mxu0 %v1759_v9  ;;  %3482 = vmatprep.mubr.msk.f32.mxu1 %vm3697_vm0, %v3696_v0  ;;  %v2086_v21 = vsel %vm568_vm3, %v2082_v1, %v2084_v18 }
 0x2c5   : > { %3485 = vmatprep.subr.mxu1 %v3696_v0  ;;  %1937 = vmatpush1.msra.mxu0 %v1769_v11 }
 0x2c6   : > { %3483 = vmatmul.mubr.msk.f32.vlgmr.msra.gmra.mrb[20].mxu1 %vm271_vm2, %v1772_v19  ;;  %2093 = vmatprep.subr.mxu0 %v2086_v21 }
 0x2c7   : > { %v2080_v22 = vpop.permute.xlu0 %2079  ;;  %3486 = vmatpush3.msra.mxu1 %v2084_v18  ;;  %3487 = vmatprep.mubr.msk.f32.mxu1 %vm3697_vm0, %v3696_v0  ;;  %v2240_v24 = vpop.permute.xlu1 %2239 }
 0x2c8   : > { %3490 = vmatprep.subr.mxu1 %v3696_v0  ;;  %2000 = vmatprep.mubr.f32.mxu0 %v3696_v0  ;;  %v2085_v25 = vsel %vm568_vm3, %v2080_v22, %v2082_v1  ;;  %v2245_v33 = vsel %vm729_vm4, %v2240_v24, %v2242_v20 }
 0x2ca   : > { %3488 = vmatmul.mubr.msk.f32.vlgmr.msra.gmra.mrb[22].mxu1 %vm271_vm2, %v3370_v23 }
 0x2cb   : > { %v2244_v26 = vpop.permute.xlu0 %2243  ;;  %3368 = vmatmul.mubr.msk.f32.vlgmr.msra.gmra.mrb[2].mxu0 %vm271_vm2, %v1772_v19  ;;  %3492 = vmatprep.mubr.msk.f32.mxu1 %vm3697_vm0, %v3696_v0  ;;  %v2404_v27 = vpop.permute.xlu1 %2403 }
 0x2cc   : > { %3491 = vmatpush3.msra.mxu1 %v2244_v26  ;;  %2094 = vmatpush1.msra.mxu0 %v2085_v25  ;;  %v2246_v29 = vsel %vm729_vm4, %v2242_v20, %v2244_v26 }
 0x2cd   : > { %2253 = vmatprep.subr.mxu0 %v2246_v29  ;;  %3495 = vmatprep.subr.mxu1 %v3696_v0 }
 0x2ce   : > { %3493 = vmatmul.mubr.msk.f32.vlgmr.msra.gmra.mrb[24].mxu1 %vm271_vm2, %v3373_v28  ;;  %2157 = vmatprep.mubr.f32.mxu0 %v3696_v0 }
 0x2cf   : > { %v2402_v30 = vpop.permute.xlu0 %2401  ;;  %3496 = vmatpush3.msra.mxu1 %v2404_v27  ;;  %3497 = vmatprep.mubr.msk.f32.mxu1 %vm3697_vm0, %v3696_v0  ;;  %v2562_v31 = vpop.permute.xlu1 %2561 }
 0x2d0   : > { %3500 = vmatprep.subr.mxu1 %v3696_v0  ;;  %v2406_v36 = vsel %vm890_vm5, %v2402_v30, %v2404_v27 }
 0x2d2   : > { %3498 = vmatmul.mubr.msk.f32.vlgmr.msra.gmra.mrb[26].mxu1 %vm271_vm2, %v3376_v32 }
 0x2d3   : > { %v2400_v34 = vpop.permute.xlu0 %2399  ;;  %3371 = vmatmul.mubr.msk.f32.vlgmr.msra.gmra.mrb[2].mxu0 %vm271_vm2, %v3370_v23  ;;  %v2560_v35 = vpop.permute.xlu1 %2559  ;;  %3502 = vmatprep.mubr.msk.f32.mxu1 %vm3697_vm0, %v3696_v0 }
 0x2d4   : > { %2254 = vmatpush1.msra.mxu0 %v2245_v33  ;;  %2317 = vmatprep.mubr.f32.mxu0 %v3696_v0  ;;  %v2405_v41 = vsel %vm890_vm5, %v2400_v34, %v2402_v30  ;;  %v2565_v48 = vsel %vm1051_vm6, %v2560_v35, %v2562_v31 }
 0x2d5   : > { %2413 = vmatprep.subr.mxu0 %v2406_v36 }
 0x2d7   : > { %v2564_v38 = vpop.permute.xlu0 %2563  ;;  %v2724_v39 = vpop.permute.xlu1 %2723 }
 0x2d8   : > { %3501 = vmatpush3.msra.mxu1 %v2564_v38  ;;  %v2566_v44 = vsel %vm1051_vm6, %v2562_v31, %v2564_v38 }
 0x2d9   : > { %3505 = vmatprep.subr.mxu1 %v3696_v0  ;;  %3503 = vmatmul.mubr.msk.f32.vlgmr.msra.gmra.mrb[28].mxu1 %vm271_vm2, %v3379_v37 }
 0x2da   : > { %3506 = vmatpush3.msra.mxu1 %v2724_v39  ;;  %3507 = vmatprep.mubr.msk.f32.mxu1 %vm3697_vm0, %v3696_v0 }
 0x2db   : > { %v2722_v42 = vpop.permute.xlu0 %2721  ;;  %3374 = vmatmul.mubr.msk.f32.vlgmr.msra.gmra.mrb[2].mxu0 %vm271_vm2, %v3373_v28  ;;  %3510 = vmatprep.subr.mxu1 %v3696_v0  ;;  %v2882_v43 = vpop.permute.xlu1 %2881 }
 0x2dc   : > { %2414 = vmatpush1.msra.mxu0 %v2405_v41  ;;  %2477 = vmatprep.mubr.f32.mxu0 %v3696_v0  ;;  %v2726_v50 = vsel %vm1212_vm7, %v2722_v42, %v2724_v39 }
 0x2dd   : > { %2573 = vmatprep.subr.mxu0 %v2566_v44  ;;  %3508 = vmatmul.mubr.msk.f32.vlgmr.msra.gmra.mrb[30].mxu1 %vm271_vm2, %v3382_v40 }
 0x2de   : > { %3512 = vmatprep.mubr.msk.f32.mxu1 %vm3697_vm0, %v3696_v0 }
 0x2df   : > { %v2720_v45 = vpop.permute.xlu0 %2719  ;;  %v2880_v46 = vpop.permute.xlu1 %2879 }
 0x2e0   : > { %v2725_v53 = vsel %vm1212_vm7, %v2720_v45, %v2722_v42  ;;  %v2885_v56 = vsel %vm1373_vm8, %v2880_v46, %v2882_v43 }
 0x2e3   : > { %v2884_v49 = vpop.permute.xlu0 %2883  ;;  %3377 = vmatmul.mubr.msk.f32.vlgmr.msra.gmra.mrb[2].mxu0 %vm271_vm2, %v3376_v32  ;;  %v3044_v51 = vpop.permute.xlu1 %3043 }
 0x2e4   : > { %3511 = vmatpush3.msra.mxu1 %v2884_v49  ;;  %2574 = vmatpush1.msra.mxu0 %v2565_v48  ;;  %v2886_v54 = vsel %vm1373_vm8, %v2882_v43, %v2884_v49 }
 0x2e5   : > { %2733 = vmatprep.subr.mxu0 %v2726_v50  ;;  %3513 = vmatmul.mubr.msk.f32.vlgmr.msra.gmra.mrb[32].mxu1 %vm271_vm2, %v3385_v47 }
 0x2e6   : > { %3515 = vmatprep.subr.mxu1 %v3696_v0  ;;  %3517 = vmatprep.mubr.msk.f32.mxu1 %vm3697_vm0, %v3696_v0 }
 0x2e7   : > { %3516 = vmatpush3.msra.mxu1 %v3044_v51  ;;  %2637 = vmatprep.mubr.f32.mxu0 %v3696_v0  ;;  %v3042_v55 = vpop.permute.xlu0 %3041 }
 0x2e8   : > { %v3046_v57 = vsel %vm1534_vm9, %v3042_v55, %v3044_v51 }
 0x2e9   : > { %3518 = vmatmul.mubr.msk.f32.vlgmr.msra.gmra.mrb[34].mxu1 %vm271_vm2, %v3388_v52 }
 0x2eb   : > { %3380 = vmatmul.mubr.msk.f32.vlgmr.msra.gmra.mrb[2].mxu0 %vm271_vm2, %v3379_v37  ;;  %v3040_v58 = vpop.permute.xlu0 %3039 }
 0x2ec   : > { %2734 = vmatpush1.msra.mxu0 %v2725_v53  ;;  %2797 = vmatprep.mubr.f32.mxu0 %v3696_v0  ;;  %v3045_v59 = vsel %vm1534_vm9, %v3040_v58, %v3042_v55 }
 0x2ed   : > { %2893 = vmatprep.subr.mxu0 %v2886_v54 }
 0x2ef   : > { %v3243_v33 = vpop.permute.xlu0 %3242 }
 0x2f3   : > { %3383 = vmatmul.mubr.msk.f32.vlgmr.msra.gmra.mrb[2].mxu0 %vm271_vm2, %v3382_v40  ;;  %v3247_v43 = vpop.permute.xlu0 %3246 }
 0x2f4   : > { %2894 = vmatpush1.msra.mxu0 %v2885_v56  ;;  %2957 = vmatprep.mubr.f32.mxu0 %v3696_v0  ;;  %v3201_v20 = vpop.permute.xlu1 %3200 }
 0x2f5   : > { %3053 = vmatprep.subr.mxu0 %v3046_v57 }
 0x2f8   : > { %v3245_v53 = vpop.permute.xlu1 %3244 }
 0x2f9   : > { %v3249_v58 = vsel %vm890_vm5, %v3245_v53, %v3247_v43 }
 0x2fb   : > { %3386 = vmatmul.mubr.msk.f32.vlgmr.msra.gmra.mrb[2].mxu0 %vm271_vm2, %v3385_v47 }
 0x2fc   : > { %3054 = vmatpush1.msra.mxu0 %v3045_v59  ;;  %3117 = vmatprep.mubr.f32.mxu0 %v3696_v0 }
 0x303   : > { %3389 = vmatmul.mubr.msk.f32.vlgmr.msra.gmra.mrb[2].mxu0 %vm271_vm2, %v3388_v52 }
 0x395   : > { %v1929_v60 = vpop.f32.mrb[18].mxu1 }
 0x396   : > { %v3479_v61 = vpop.f32.mrb[19].mxu1 }
 0x399   : > { %v2073_v62 = vpop.f32.mrb[20].mxu1 }
 0x39a   : > { %v2074_v63 = vadd.f32 %v2073_v62, %v1929_v60  ;;  %v3484_v4 = vpop.f32.mrb[21].mxu1  ;;  %v3248_v60 = vsel %vm890_vm5, %v3243_v33, %v3245_v53 }
 0x39d   : > { %v2230_v5 = vpop.f32.mrb[22].mxu1 }
 0x39e   : > { %v2236_v6 = vadd.f32 %v2230_v5, %v2074_v63  ;;  %v3489_v7 = vpop.f32.mrb[23].mxu1 }
 0x3a1   : > { %v2390_v8 = vpop.f32.mrb[24].mxu1 }
 0x3a2   : > { %v2396_v9 = vadd.f32 %v2390_v8, %v2236_v6  ;;  %v3494_v10 = vpop.f32.mrb[25].mxu1 }
 0x3a5   : > { %v2550_v11 = vpop.f32.mrb[26].mxu1 }
 0x3a6   : > { %v2556_v12 = vadd.f32 %v2550_v11, %v2396_v9  ;;  %v3499_v13 = vpop.f32.mrb[27].mxu1 }
 0x3ac   : > { %v2710_v14 = vpop.f32.mrb[28].mxu1 }
 0x3ad   : > { %v2716_v15 = vadd.f32 %v2710_v14, %v2556_v12  ;;  %v3504_v16 = vpop.f32.mrb[29].mxu1 }
 0x3b0   : > { %v2870_v0 = vpop.f32.mrb[30].mxu1 }
 0x3b1   : > { %v2876_v17 = vadd.f32 %v2870_v0, %v2716_v15  ;;  %v3509_v18 = vpop.f32.mrb[31].mxu1 }
 0x3b8   : > { %v3030_v2 = vpop.f32.mrb[32].mxu1 }
 0x3b9   : > { %v3036_v3 = vadd.f32 %v3030_v2, %v2876_v17  ;;  %v3514_v1 = vpop.f32.mrb[33].mxu1 }
 0x3bc   : > { %v3190_v19 = vpop.f32.mrb[34].mxu1 }
 0x3bd   : > { %v3196_v21 = vadd.f32 %v3190_v19, %v3036_v3  ;;  %v3519_v22 = vpop.f32.mrb[35].mxu1 }
 0x3bf   : > { %v3205_v23 = vadd.f32 %v3201_v20, %v3196_v21 }
 0x3c1   : > { %v3208_v24 = vand.u32 2147483647, %v3205_v23  ;;  %vm3220_vm0 = vcmp.ge.f32.partialorder %v3205_v23, 0.0 }
 0x3c3   : > { %v3211_v25 = vsub.f32 0.0, %v3208_v24 }
 0x3c5   : > { %v3216_v26 = vmul.f32 1.442695, %v3211_v25 }
 0x3c7   : > { %3620 = vpow2.f32 %v3216_v26 }
 0x3d1   : > { %v3621_v27 = vpop.eup %3620 }
 0x3d2   : > { %v3229_v28 = vadd.f32 1.0, %v3621_v27  ;;  %v3223_v36 = vsel %vm3220_vm0, 1.0, %v3621_v27 }
 0x3d3   : > { %v3226_v40 = vmul.f32 %v3223_v36, %v3205_v23 }
 0x3d4   : > { %3622 = vrcp.f32 %v3229_v28 }
 0x3d6   : > { %v3119_v29 = vpop.f32.mrb[2].mxu0 }
 0x3d7   : > { %v3203_v30 = vadd.f32 %v3201_v20, %v3119_v29  ;;  %v3121_v31 = vpop.f32.mrb[3].mxu0 }
 0x3d8   : > { %v3204_v32 = vadd.f32 %v3201_v20, %v3121_v31 }
 0x3d9   : > { %v3206_v34 = vand.u32 2147483647, %v3203_v30  ;;  %vm3218_vm2 = vcmp.ge.f32.partialorder %v3203_v30, 0.0 }
 0x3da   : > { %v3207_v35 = vand.u32 2147483647, %v3204_v32  ;;  %vm3219_vm3 = vcmp.ge.f32.partialorder %v3204_v32, 0.0 }
 0x3db   : > { %v3209_v37 = vsub.f32 0.0, %v3206_v34 }
 0x3dc   : > { %v3210_v38 = vsub.f32 0.0, %v3207_v35 }
 0x3dd   : > { %v3212_v39 = vmul.f32 1.442695, %v3209_v37 }
 0x3de   : > { %v3623_v41 = vpop.eup %3622  ;;  %v3214_v42 = vmul.f32 1.442695, %v3210_v38 }
 0x3df   : > { %3624 = vpow2.f32 %v3212_v39  ;;  %v3235_v44 = vmul.f32 %v3623_v41, %v3226_v40 }
 0x3e0   : > { %3626 = vpow2.f32 %v3214_v42 }
 0x3e1   : > { %v3255_v45 = vadd.f32 %v3247_v43, %v3235_v44 }
 0x3e3   : > { %3259 = vst.msk [vmem:[%s244_s26 + $0x10] sm:$0xff] %vm3258_vm1, %v3255_v45 }
 0x3e9   : > { %v3625_v46 = vpop.eup %3624 }
 0x3ea   : > { %v3627_v47 = vpop.eup %3626  ;;  %v3227_v48 = vadd.f32 1.0, %v3625_v46  ;;  %v3221_v50 = vsel %vm3218_vm2, 1.0, %v3625_v46 }
 0x3eb   : > { %v3228_v49 = vadd.f32 1.0, %v3627_v47  ;;  %v3222_v51 = vsel %vm3219_vm3, 1.0, %v3627_v47  ;;  %v3224_v52 = vmul.f32 %v3221_v50, %v3203_v30 }
 0x3ec   : > { %3628 = vrcp.f32 %v3227_v48  ;;  %v3225_v55 = vmul.f32 %v3222_v51, %v3204_v32 }
 0x3ed   : > { %3630 = vrcp.f32 %v3228_v49 }
 0x3f6   : > { %v3629_v54 = vpop.eup %3628 }
 0x3f7   : > { %v3631_v56 = vpop.eup %3630  ;;  %v3231_v57 = vmul.f32 %v3629_v54, %v3224_v52 }
 0x3f8   : > { %v3233_v59 = vmul.f32 %v3631_v56, %v3225_v55 }
 0x3f9   : > { %v3253_v61 = vadd.f32 %v3248_v60, %v3231_v57 }
 0x3fa   : > { %v3254_v62 = vadd.f32 %v3249_v58, %v3233_v59 }
 0x3fb   : > { %3256 = vst [vmem:[%s244_s26] sm:$0xff] %v3253_v61 }
 0x3fc   : > { %3257 = vst [vmem:[%s244_s26 + $0x8] sm:$0xff] %v3254_v62 }
 0x3fd   : > { %3645 = shalt.err (!%p3642_p3)
}
 0x3fe   : > { %s3646_s16 = scalar_lea.hbm %s4098_s13, 384  ;;  %s3650_s19 = scalar_lea.hbm %s4148_s6, 768 }
 0x3ff   : > { %p3647_p4 = scmp.ne.s32.totalorder %s4098_s13, %s3646_s16  ;;  %p3651_p9 = scmp.lt.u32.totalorder %s4098_s13, %s4148_s6 }
 0x400   : > { %p3652_p10 = scmp.lt.u32.totalorder %s3650_s19, %s3646_s16  ;;  %p3654_p12 = scmp.lt.u32.totalorder %s3646_s16, %s4098_s13 }
 0x401   : > { %p3648_p7 = pnand %p3647_p4, %p3782_p5 }
 0x402   : > { %p3653_p11 = por %p3652_p10, %p3651_p9 }
 0x403   : > { %p3649_p8 = pneg %p3648_p7 }
 0x404   : > { %p3655_p13 = por %p3654_p12, %p3653_p11 }
 0x406   : > { %p3656_p0 = pnand %p3655_p13, %p3649_p8 }
 0x408   : > { %3659 = shalt.err (!%p3656_p0)
}
 0x409   : > { %3555 = dma.vmem_to_hbm [thread:$0]  (%p3782_p5), %s4100_s10, 384, %s4098_s13, %s3261_s25  }
 0x40a PF: > { %p3561_p1 = scmp.ge.s32.totalorder %s3694_s24, 2  ;;  %s3287_s9 = sand.u32 1, %s3682_s21  }
 0x40b   : > { %s3288_s11 = scalar_lea.sflag [#allocation4], %s3287_s9 }
 0x40c   : > { %p3558_p2 = pnand %p3561_p1, %p3786_p6 }
 0x40e   : > { %3677 = dma.done.wait (!%p3558_p2), %s3288_s11, 384  }
 0x40f   : > { %3679 = vsyncadd (!%p3558_p2), %s3288_s11, 4294966912  ;;  %p16_p3 = scmp.ge.s32.totalorder %s3769_s27, 4   ;;  %s4151_s21 = smov %s3686_s22 }
 0x410   : > { %s4152_s22 = smov %s3690_s23  ;;  %s4153_s23 = smov %s3780_s30 }
 0x411   : > { %s4154_s24 = smov %s3769_s27  ;;  %18 = sbr.rel (!%p16_p3) target bundleno = 3 (0x3), region = 95 }
 0x418   :  { %3293 = vsyncpa [#allocation4], 1 }
 0x419   :  { %3295 = vsyncpa [#allocation4 + $0x1], 1 }

</bundles_post_ra>
